<compile_context>
chip_gen: v5e
topology: v5e:2x2
jax: 0.10.0
libtpu: 0.0.40
codegen_flags: <defaults>
</compile_context>

<pallas_src>
import functools
import math

import jax
import jax.numpy as jnp
from jax.experimental import pallas as pl
from jax.experimental.pallas import tpu as pltpu


# ---------------------------------------------------------------------------
# VMEM limit & tiling helpers
# ---------------------------------------------------------------------------
_VMEM_LIMIT = None


def _vmem_limit_bytes():
    """~75% of physical VMEM (96 MiB on v5e/v6e, 48 MiB on v7x), capped at 100 MiB."""
    global _VMEM_LIMIT
    if _VMEM_LIMIT is None:
        try:
            cap = pltpu.get_tpu_info().vmem_capacity_bytes
        except Exception:
            cap = 64 * 1024 * 1024          # conservative fallback (v7x-sized)
        _VMEM_LIMIT = min((cap * 3) // 4, 100 * 1024 * 1024)
    return _VMEM_LIMIT


def _cparams(semantics):
    return pltpu.CompilerParams(dimension_semantics=semantics,
                                vmem_limit_bytes=_vmem_limit_bytes())


def _round_up(n, m):
    return ((n + m - 1) // m) * m


def _choose_row_tiling(n, pref=256):
    """Row-tile size (multiple of 8) and padded row count.

    Pads the row count instead of silently using a full-extent block, and
    prefers >= 2 grid steps so v7x's two TensorCores both get work."""
    n_pad = _round_up(max(n, 1), 8)
    tm = min(pref, n_pad)
    if n_pad // tm < 2 and tm >= 16:
        tm = _round_up(tm // 2, 8)
    n_pad = _round_up(n_pad, tm)
    return tm, n_pad


def _pick_weight_tile(n, pref, mult=128):
    """Largest multiple of `mult` <= pref dividing n, else full extent
    (weight axes are model hyperparameters, normally 128-aligned)."""
    if n <= pref:
        return n
    d = (pref // mult) * mult
    while d >= mult:
        if n % d == 0:
            return d
        d -= mult
    return n


# ---------------------------------------------------------------------------
# LayerNormalization (matches the PyTorch reference: unbiased std, std - eps)
# ---------------------------------------------------------------------------
def _ln_rows(x, alpha, bias, eps):
    xf = x.astype(jnp.float32)
    d = xf.shape[-1]
    mean = jnp.mean(xf, axis=-1, keepdims=True)
    var = jnp.sum((xf - mean) ** 2, axis=-1, keepdims=True) / (d - 1)   # unbiased
    inv = 1.0 / (jnp.sqrt(var) - eps)        # one divide per row, then multiply
    return alpha * (xf - mean) * inv + bias


# ---------------------------------------------------------------------------
# Fused LayerNorm + Linear  (used for LN->QKV and LN->Q projections)
# ---------------------------------------------------------------------------
def _ln_linear_kernel(x_ref, alpha_ref, bias_ref, w_ref, b_ref, o_ref, *, eps):
    xn = _ln_rows(x_ref[...], alpha_ref[0], bias_ref[0], eps)
    y = jnp.dot(xn.astype(w_ref.dtype), w_ref[...],
                preferred_element_type=jnp.float32)
    o_ref[...] = (y + b_ref[...].astype(jnp.float32)).astype(o_ref.dtype)


def ln_linear(x, alpha, bias, w, b, *, eps=1e-6, tm=256):
    *lead, d = x.shape
    n = x.size // d
    dout = w.shape[1]
    x2 = x.reshape(n, d)
    tm, n_pad = _choose_row_tiling(n, tm)
    if n_pad != n:
        x2 = jnp.pad(x2, ((0, n_pad - n), (0, 0)))
    out = pl.pallas_call(
        functools.partial(_ln_linear_kernel, eps=eps),
        out_shape=jax.ShapeDtypeStruct((n_pad, dout), x.dtype),
        grid=(n_pad // tm,),
        in_specs=[
            pl.BlockSpec((tm, d), lambda i: (i, 0)),
            pl.BlockSpec(memory_space=pltpu.MemorySpace.SMEM),   # alpha (scalar)
            pl.BlockSpec(memory_space=pltpu.MemorySpace.SMEM),   # bias  (scalar)
            pl.BlockSpec((d, dout), lambda i: (0, 0)),           # resident weight
            pl.BlockSpec((1, dout), lambda i: (0, 0)),
        ],
        out_specs=pl.BlockSpec((tm, dout), lambda i: (i, 0)),
        compiler_params=_cparams(("parallel",)),
    )(x2, alpha, bias, w, b.reshape(1, dout))
    if n_pad != n:
        out = out[:n]
    return out.reshape(*lead, dout)


# ---------------------------------------------------------------------------
# Plain Linear (encoder-output K/V projection — no LayerNorm on that input)
# ---------------------------------------------------------------------------
def _linear_kernel(x_ref, w_ref, b_ref, o_ref):
    y = jnp.dot(x_ref[...], w_ref[...], preferred_element_type=jnp.float32)
    o_ref[...] = (y + b_ref[...].astype(jnp.float32)).astype(o_ref.dtype)


def linear(x, w, b, *, tm=256):
    *lead, d = x.shape
    n = x.size // d
    dout = w.shape[1]
    x2 = x.reshape(n, d)
    tm, n_pad = _choose_row_tiling(n, tm)
    if n_pad != n:
        x2 = jnp.pad(x2, ((0, n_pad - n), (0, 0)))
    out = pl.pallas_call(
        _linear_kernel,
        out_shape=jax.ShapeDtypeStruct((n_pad, dout), x.dtype),
        grid=(n_pad // tm,),
        in_specs=[
            pl.BlockSpec((tm, d), lambda i: (i, 0)),
            pl.BlockSpec((d, dout), lambda i: (0, 0)),
            pl.BlockSpec((1, dout), lambda i: (0, 0)),
        ],
        out_specs=pl.BlockSpec((tm, dout), lambda i: (i, 0)),
        compiler_params=_cparams(("parallel",)),
    )(x2, w, b.reshape(1, dout))
    if n_pad != n:
        out = out[:n]
    return out.reshape(*lead, dout)


# ---------------------------------------------------------------------------
# Attention core (+ fused output projection + residual add)
#   - per-batch grid step, all heads processed inside the kernel
#   - no wrapper transposes; heads are static column slices of the projections
#   - single shared (Sq, Skv) mask (no head broadcast)
#   - scores via dot_general contracting last dims (no k.T)
#   - output written as a lane-dense (Sq, d_model) tile
# ---------------------------------------------------------------------------
def _mha_heads(q, k, v, masked, *, h, scale):
    d = q.shape[-1]
    dk = d // h
    outs = []
    for i in range(h):
        qh = q[:, i * dk:(i + 1) * dk]
        kh = k[:, i * dk:(i + 1) * dk]
        vh = v[:, i * dk:(i + 1) * dk]
        s = jax.lax.dot_general(qh, kh, (((1,), (1,)), ((), ())),
                                preferred_element_type=jnp.float32) * scale
        s = jnp.where(masked, -1e9, s)            # masked_fill(mask == 0, -1e9)
        s = s - jnp.max(s, axis=-1, keepdims=True)
        p = jnp.exp(s)
        p = p * pl.reciprocal(jnp.sum(p, axis=-1, keepdims=True), approx=True)
        # attention dropout: identity (inference mode)
        outs.append(jax.lax.dot_general(p.astype(vh.dtype), vh,
                                        (((1,), (0,)), ((), ())),
                                        preferred_element_type=jnp.float32))
    return jnp.concatenate(outs, axis=-1)          # (Sq, d_model) f32


def _self_attn_kernel(qkv_ref, m_ref, wo_ref, bo_ref, r_ref, o_ref, *, h, d, scale):
    qkv = qkv_ref[...]
    attn = _mha_heads(qkv[:, :d], qkv[:, d:2 * d], qkv[:, 2 * d:3 * d],
                      m_ref[...] == 0, h=h, scale=scale)
    y = jnp.dot(attn.astype(wo_ref.dtype), wo_ref[...],
                preferred_element_type=jnp.float32)
    o_ref[...] = (y + bo_ref[...].astype(jnp.float32)
                  + r_ref[...].astype(jnp.float32)).astype(o_ref.dtype)


def _cross_attn_kernel(q_ref, kv_ref, m_ref, wo_ref, bo_ref, r_ref, o_ref, *, h, d, scale):
    kv = kv_ref[...]
    attn = _mha_heads(q_ref[...], kv[:, :d], kv[:, d:2 * d],
                      m_ref[...] == 0, h=h, scale=scale)
    y = jnp.dot(attn.astype(wo_ref.dtype), wo_ref[...],
                preferred_element_type=jnp.float32)
    o_ref[...] = (y + bo_ref[...].astype(jnp.float32)
                  + r_ref[...].astype(jnp.float32)).astype(o_ref.dtype)


def _prep_mask(mask, B, Sq, Skv):
    """Head-independent (B, Sq, Skv) int32 mask (no O(h) broadcast)."""
    if mask is None:
        return jnp.ones((B, Sq, Skv), jnp.int32)
    m = mask
    if m.ndim == 4:
        # TODO(synk): per-head masks (mask.shape[1] == h > 1) would need the head axis.
        m = m[:, 0]
    return jnp.broadcast_to(m, (B, Sq, Skv)).astype(jnp.int32)


def self_attention(qkv, mask, wo, bo, residual, *, h):
    B, Sq, D3 = qkv.shape
    d = D3 // 3
    scale = 1.0 / math.sqrt(d // h)
    m = _prep_mask(mask, B, Sq, Sq)
    return pl.pallas_call(
        functools.partial(_self_attn_kernel, h=h, d=d, scale=scale),
        out_shape=jax.ShapeDtypeStruct((B, Sq, d), residual.dtype),
        grid=(B,),
        in_specs=[
            pl.BlockSpec((None, Sq, D3), lambda b: (b, 0, 0)),   # fused QKV
            pl.BlockSpec((None, Sq, Sq), lambda b: (b, 0, 0)),   # mask
            pl.BlockSpec((d, d), lambda b: (0, 0)),              # Wo (resident)
            pl.BlockSpec((1, d), lambda b: (0, 0)),              # bo
            pl.BlockSpec((None, Sq, d), lambda b: (b, 0, 0)),    # residual
        ],
        out_specs=pl.BlockSpec((None, Sq, d), lambda b: (b, 0, 0)),
        compiler_params=_cparams(("parallel",)),
    )(qkv, m, wo, bo.reshape(1, d), residual)


def cross_attention(q, kv, mask, wo, bo, residual, *, h):
    B, Sq, d = q.shape
    Skv = kv.shape[1]
    scale = 1.0 / math.sqrt(d // h)
    m = _prep_mask(mask, B, Sq, Skv)
    return pl.pallas_call(
        functools.partial(_cross_attn_kernel, h=h, d=d, scale=scale),
        out_shape=jax.ShapeDtypeStruct((B, Sq, d), residual.dtype),
        grid=(B,),
        in_specs=[
            pl.BlockSpec((None, Sq, d), lambda b: (b, 0, 0)),       # Q
            pl.BlockSpec((None, Skv, 2 * d), lambda b: (b, 0, 0)),  # fused KV
            pl.BlockSpec((None, Sq, Skv), lambda b: (b, 0, 0)),     # mask
            pl.BlockSpec((d, d), lambda b: (0, 0)),                 # Wo
            pl.BlockSpec((1, d), lambda b: (0, 0)),                 # bo
            pl.BlockSpec((None, Sq, d), lambda b: (b, 0, 0)),       # residual
        ],
        out_specs=pl.BlockSpec((None, Sq, d), lambda b: (b, 0, 0)),
        compiler_params=_cparams(("parallel",)),
    )(q, kv, m, wo, bo.reshape(1, d), residual)


# ---------------------------------------------------------------------------
# Fused LayerNorm + FeedForward + residual   (d_ff blocked, f32 accumulator)
# ---------------------------------------------------------------------------
def _ln_ffn_kernel(x_ref, alpha_ref, bias_ref, w1_ref, b1_ref, w2_ref, b2_ref,
                   r_ref, o_ref, xn_ref, acc_ref, *, eps):
    kstep = pl.program_id(1)

    @pl.when(kstep == 0)
    def _():
        xn_ref[...] = _ln_rows(x_ref[...], alpha_ref[0], bias_ref[0], eps)
        acc_ref[...] = jnp.zeros_like(acc_ref)

    hmid = jnp.dot(xn_ref[...].astype(w1_ref.dtype), w1_ref[...],
                   preferred_element_type=jnp.float32)
    hmid = jnp.maximum(hmid + b1_ref[...].astype(jnp.float32), 0.0)   # ReLU; dropout=identity
    acc_ref[...] += jnp.dot(hmid.astype(w2_ref.dtype), w2_ref[...],
                            preferred_element_type=jnp.float32)

    @pl.when(kstep == pl.num_programs(1) - 1)
    def _():
        o_ref[...] = (acc_ref[...] + b2_ref[...].astype(jnp.float32)
                      + r_ref[...].astype(jnp.float32)).astype(o_ref.dtype)


def ln_ffn(x, alpha, bias, w1, b1, w2, b2, residual, *, eps=1e-6, tm=256, tk=512):
    """w1: (d_model, d_ff), w2: (d_ff, d_model) — stored pre-transposed."""
    *lead, d_model = x.shape
    n = x.size // d_model
    d_ff = w1.shape[1]
    x2 = x.reshape(n, d_model)
    r2 = residual.reshape(n, d_model)
    tm, n_pad = _choose_row_tiling(n, tm)
    if n_pad != n:
        pad = ((0, n_pad - n), (0, 0))
        x2 = jnp.pad(x2, pad)
        r2 = jnp.pad(r2, pad)
    tk = _pick_weight_tile(d_ff, tk, 128)
    grid = (n_pad // tm, d_ff // tk)
    out = pl.pallas_call(
        functools.partial(_ln_ffn_kernel, eps=eps),
        out_shape=jax.ShapeDtypeStruct((n_pad, d_model), x.dtype),
        grid=grid,
        in_specs=[
            pl.BlockSpec((tm, d_model), lambda i, k: (i, 0)),    # x (constant over k)
            pl.BlockSpec(memory_space=pltpu.MemorySpace.SMEM),   # alpha
            pl.BlockSpec(memory_space=pltpu.MemorySpace.SMEM),   # bias
            pl.BlockSpec((d_model, tk), lambda i, k: (0, k)),    # W1 column tile
            pl.BlockSpec((1, tk),       lambda i, k: (0, k)),    # b1 tile
            pl.BlockSpec((tk, d_model), lambda i, k: (k, 0)),    # W2 row tile
            pl.BlockSpec((1, d_model),  lambda i, k: (0, 0)),    # b2
            pl.BlockSpec((tm, d_model), lambda i, k: (i, 0)),    # residual
        ],
        out_specs=pl.BlockSpec((tm, d_model), lambda i, k: (i, 0)),
        scratch_shapes=[pltpu.VMEM((tm, d_model), jnp.float32),   # cached LN(x)
                        pltpu.VMEM((tm, d_model), jnp.float32)],  # f32 accumulator
        compiler_params=_cparams(("parallel", "arbitrary")),
    )(x2, alpha, bias, w1, b1.reshape(1, d_ff), w2, b2.reshape(1, d_model), r2)
    if n_pad != n:
        out = out[:n]
    return out.reshape(*lead, d_model)


# ---------------------------------------------------------------------------
# DecoderBlock forward (6 fused pallas_calls per block)
# ---------------------------------------------------------------------------
def decoder_block(x, encoder_output, src_mask, tgt_mask, params, *, h):
    # 1) self-attention sublayer: LN fused into the QKV projection; attention
    #    core + output projection + residual add fused into one kernel.
    pa = params["self_attn"]
    qkv = ln_linear(x, params["norm0_alpha"], params["norm0_bias"],
                    pa["w_qkv"], pa["b_qkv"])
    x = self_attention(qkv, tgt_mask, pa["wo"], pa["bo"], residual=x, h=h)

    # 2) cross-attention sublayer: LN fused into the Q projection; K/V come
    #    from the (un-normalized) encoder output via one fused KV projection.
    pa = params["cross_attn"]
    q = ln_linear(x, params["norm1_alpha"], params["norm1_bias"],
                  pa["wq"], pa["bq"])
    kv = linear(encoder_output, pa["w_kv"], pa["b_kv"])
    x = cross_attention(q, kv, src_mask, pa["wo"], pa["bo"], residual=x, h=h)

    # 3) feed-forward sublayer: LN + linear1 + ReLU + linear2 + residual fused.
    pf = params["ffn"]
    x = ln_ffn(x, params["norm2_alpha"], params["norm2_bias"],
               pf["w1"], pf["b1"], pf["w2"], pf["b2"], residual=x)
    return x


def pack_decoder_params(p):
    """One-time packing of per-projection weights into fused QKV / KV weights."""
    def pack_attn(a):
        return dict(
            w_qkv=jnp.concatenate([a["wq"], a["wk"], a["wv"]], axis=1),
            b_qkv=jnp.concatenate([a["bq"], a["bk"], a["bv"]], axis=0),
            wq=a["wq"], bq=a["bq"],
            w_kv=jnp.concatenate([a["wk"], a["wv"]], axis=1),
            b_kv=jnp.concatenate([a["bk"], a["bv"]], axis=0),
            wo=a["wo"], bo=a["bo"])
    out = dict(p)
    out["self_attn"] = pack_attn(p["self_attn"])
    out["cross_attn"] = pack_attn(p["cross_attn"])
    return out


# ---------------------------------------------------------------------------
# Pure-JAX reference (mirrors the PyTorch module exactly)
# ---------------------------------------------------------------------------
def _layer_norm_ref(x, alpha, bias, eps=1e-6):
    mean = jnp.mean(x, axis=-1, keepdims=True)
    std = jnp.std(x, axis=-1, keepdims=True, ddof=1)
    return alpha * (x - mean) / (std - eps) + bias


def _mha_ref(q_in, k_in, v_in, mask, p, h):
    B, Sq, D = q_in.shape
    Skv = k_in.shape[1]
    dk = D // h
    q = q_in @ p["wq"] + p["bq"]
    k = k_in @ p["wk"] + p["bk"]
    v = v_in @ p["wv"] + p["bv"]
    q = q.reshape(B, Sq, h, dk).transpose(0, 2, 1, 3)
    k = k.reshape(B, Skv, h, dk).transpose(0, 2, 1, 3)
    v = v.reshape(B, Skv, h, dk).transpose(0, 2, 1, 3)
    s = (q @ k.transpose(0, 1, 3, 2)) / math.sqrt(dk)
    s = jnp.where(mask == 0, -1e9, s)
    a = jax.nn.softmax(s, axis=-1)
    o = (a @ v).transpose(0, 2, 1, 3).reshape(B, Sq, D)
    return o @ p["wo"] + p["bo"]


def _decoder_block_ref(x, enc, src_mask, tgt_mask, params, h):
    xn = _layer_norm_ref(x, params["norm0_alpha"], params["norm0_bias"])
    x = x + _mha_ref(xn, xn, xn, tgt_mask, params["self_attn"], h)
    xn = _layer_norm_ref(x, params["norm1_alpha"], params["norm1_bias"])
    x = x + _mha_ref(xn, enc, enc, src_mask, params["cross_attn"], h)
    xn = _layer_norm_ref(x, params["norm2_alpha"], params["norm2_bias"])
    hdd = jnp.maximum(xn @ params["ffn"]["w1"] + params["ffn"]["b1"], 0.0)
    return x + (hdd @ params["ffn"]["w2"] + params["ffn"]["b2"])


if __name__ == "__main__":
    batch, seq_tgt, seq_src = 2, 16, 8
    d_model, h, d_ff = 128, 4, 1024     # d_model multiple of 128 -> lane-dense
    assert d_model % h == 0
    dtype = jnp.float32

    key = jax.random.PRNGKey(0)
    keys = list(jax.random.split(key, 16))
    kit = iter(keys)

    def _linear_params(kin, din, dout):
        kw, kb = jax.random.split(kin)
        lim = 1.0 / math.sqrt(din)
        # stored pre-transposed: (in_features, out_features)
        w = jax.random.uniform(kw, (din, dout), dtype, -lim, lim)
        b = jax.random.uniform(kb, (dout,), dtype, -lim, lim)
        return w, b

    def _attn_params(kin):
        ks = jax.random.split(kin, 4)
        wq, bq = _linear_params(ks[0], d_model, d_model)
        wk, bk = _linear_params(ks[1], d_model, d_model)
        wv, bv = _linear_params(ks[2], d_model, d_model)
        wo, bo = _linear_params(ks[3], d_model, d_model)
        return dict(wq=wq, bq=bq, wk=wk, bk=bk, wv=wv, bv=bv, wo=wo, bo=bo)

    w1, b1 = _linear_params(next(kit), d_model, d_ff)
    w2, b2 = _linear_params(next(kit), d_ff, d_model)

    params = dict(
        self_attn=_attn_params(next(kit)),
        cross_attn=_attn_params(next(kit)),
        ffn=dict(w1=w1, b1=b1, w2=w2, b2=b2),
        norm0_alpha=jax.random.uniform(next(kit), (1,), dtype, 0.5, 1.5),
        norm0_bias=jax.random.uniform(next(kit), (1,), dtype, -0.5, 0.5),
        norm1_alpha=jax.random.uniform(next(kit), (1,), dtype, 0.5, 1.5),
        norm1_bias=jax.random.uniform(next(kit), (1,), dtype, -0.5, 0.5),
        norm2_alpha=jax.random.uniform(next(kit), (1,), dtype, 0.5, 1.5),
        norm2_bias=jax.random.uniform(next(kit), (1,), dtype, -0.5, 0.5),
    )
    kparams = pack_decoder_params(params)

    x = jax.random.normal(next(kit), (batch, seq_tgt, d_model), dtype)
    enc = jax.random.normal(next(kit), (batch, seq_src, d_model), dtype)

    # Causal target mask, all-ones (no padding) source mask.
    tgt_mask = jnp.tril(jnp.ones((seq_tgt, seq_tgt), jnp.int32))[None, None]
    src_mask = jnp.ones((1, 1, 1, seq_src), jnp.int32)

    y = decoder_block(x, enc, src_mask, tgt_mask, kparams, h=h)
    y = jax.block_until_ready(y)

    y_ref = _decoder_block_ref(x, enc, src_mask, tgt_mask, params, h)
    assert y.shape == (batch, seq_tgt, d_model)
    # Tolerance 5e-3: the approximate EUP reciprocal in the softmax denominator
    # introduces a small (<~2.5e-4 relative) extra error vs. the exact divide.
    err = float(jnp.max(jnp.abs(y - y_ref)))
    assert jnp.allclose(y, y_ref, atol=5e-3, rtol=5e-3), f"mismatch vs reference: {err}"

    print("KERNEL_OK")
</pallas_src>

<mosaic_0001>
module attributes {stable_mosaic.version = 11 : i64} {
  func.func @_ln_linear_kernel(%arg0: i32, %arg1: memref<16x128xf32, #tpu.memory_space<vmem>>, %arg2: memref<1xf32, #tpu.memory_space<smem>>, %arg3: memref<1xf32, #tpu.memory_space<smem>>, %arg4: memref<128x384xf32, #tpu.memory_space<vmem>>, %arg5: memref<1x384xf32, #tpu.memory_space<vmem>>, %arg6: memref<16x384xf32, #tpu.memory_space<vmem>>) attributes {dimension_semantics = [#tpu.dimension_semantics<parallel>], iteration_bounds = array<i64: 2>, scalar_prefetch = 0 : i64, scratch_operands = 0 : i64, tpu.core_type = #tpu.core_type<tc>, window_params = [{transform_indices = @transform_0, window_bounds = array<i64: 16, 128>}, {transform_indices = @transform_1, window_bounds = array<i64: 1>}, {transform_indices = @transform_2, window_bounds = array<i64: 1>}, {pipeline_mode = #tpu.pipeline_mode<synchronous>, transform_indices = @transform_3, window_bounds = array<i64: 128, 384>}, {pipeline_mode = #tpu.pipeline_mode<synchronous>, transform_indices = @transform_4, window_bounds = array<i64: 1, 384>}, {transform_indices = @transform_5, window_bounds = array<i64: 16, 384>}]} {
    %c0 = arith.constant 0 : index
    %c0_0 = arith.constant 0 : index
    %0 = vector.load %arg1[%c0, %c0_0] : memref<16x128xf32, #tpu.memory_space<vmem>>, vector<16x128xf32>
    %c0_1 = arith.constant 0 : index
    %1 = memref.load %arg2[%c0_1] : memref<1xf32, #tpu.memory_space<smem>>
    %c0_2 = arith.constant 0 : index
    %2 = memref.load %arg3[%c0_2] : memref<1xf32, #tpu.memory_space<smem>>
    %cst = arith.constant dense<0.000000e+00> : vector<16xf32>
    %3 = vector.multi_reduction <add>, %0, %cst [1] : vector<16x128xf32> to vector<16xf32>
    %4 = vector.shape_cast %3 : vector<16xf32> to vector<16x1xf32>
    %cst_3 = arith.constant 1.280000e+02 : f32
    %5 = vector.broadcast %cst_3 : f32 to vector<16x1xf32>
    %6 = arith.divf %4, %5 : vector<16x1xf32>
    %7 = vector.broadcast %6 : vector<16x1xf32> to vector<16x128xf32>
    %8 = arith.subf %0, %7 : vector<16x128xf32>
    %9 = arith.mulf %8, %8 : vector<16x128xf32>
    %cst_4 = arith.constant dense<0.000000e+00> : vector<16xf32>
    %10 = vector.multi_reduction <add>, %9, %cst_4 [1] : vector<16x128xf32> to vector<16xf32>
    %11 = vector.shape_cast %10 : vector<16xf32> to vector<16x1xf32>
    %cst_5 = arith.constant 1.270000e+02 : f32
    %12 = vector.broadcast %cst_5 : f32 to vector<16x1xf32>
    %13 = arith.divf %11, %12 : vector<16x1xf32>
    %14 = math.sqrt %13 : vector<16x1xf32>
    %cst_6 = arith.constant 9.99999997E-7 : f32
    %15 = vector.broadcast %cst_6 : f32 to vector<16x1xf32>
    %16 = arith.subf %14, %15 : vector<16x1xf32>
    %cst_7 = arith.constant 1.000000e+00 : f32
    %17 = vector.broadcast %cst_7 : f32 to vector<16x1xf32>
    %18 = arith.divf %17, %16 : vector<16x1xf32>
    %19 = vector.broadcast %6 : vector<16x1xf32> to vector<16x128xf32>
    %20 = arith.subf %0, %19 : vector<16x128xf32>
    %21 = vector.broadcast %1 : f32 to vector<16x128xf32>
    %22 = arith.mulf %21, %20 : vector<16x128xf32>
    %23 = vector.broadcast %18 : vector<16x1xf32> to vector<16x128xf32>
    %24 = arith.mulf %22, %23 : vector<16x128xf32>
    %25 = vector.broadcast %2 : f32 to vector<16x128xf32>
    %26 = arith.addf %24, %25 : vector<16x128xf32>
    %c0_8 = arith.constant 0 : index
    %c0_9 = arith.constant 0 : index
    %27 = vector.load %arg4[%c0_8, %c0_9] : memref<128x384xf32, #tpu.memory_space<vmem>>, vector<128x384xf32>
    %cst_10 = arith.constant dense<0.000000e+00> : vector<16x384xf32>
    %28 = tpu.matmul %26, %27, %cst_10 {dimension_numbers = #tpu.dot_dimension_numbers<[1], [0], [0], [1], [0, 0, 1, 1], [], []>} : vector<16x128xf32>, vector<128x384xf32>, vector<16x384xf32> -> vector<16x384xf32>
    %c0_11 = arith.constant 0 : index
    %c0_12 = arith.constant 0 : index
    %29 = vector.load %arg5[%c0_11, %c0_12] : memref<1x384xf32, #tpu.memory_space<vmem>>, vector<1x384xf32>
    %30 = vector.broadcast %29 : vector<1x384xf32> to vector<16x384xf32>
    %31 = arith.addf %28, %30 : vector<16x384xf32>
    %c0_13 = arith.constant 0 : index
    %c0_14 = arith.constant 0 : index
    %32 = vector.load %arg6[%c0_13, %c0_14] : memref<16x384xf32, #tpu.memory_space<vmem>>, vector<16x384xf32>
    tpu.vector_store %arg6[%c0_13, %c0_14], %31 {strides = array<i32>} : memref<16x384xf32, #tpu.memory_space<vmem>>, vector<16x384xf32>,
    return
  }
  func.func @transform_0(%arg0: i32) -> (i32, i32) {
    %c0_i32 = arith.constant 0 : i32
    %c0_i32_0 = arith.constant 0 : i32
    return %arg0, %c0_i32 : i32, i32
  }
  func.func @transform_1(%arg0: i32) -> i32 {
    %c0_i32 = arith.constant 0 : i32
    %c0_i32_0 = arith.constant 0 : i32
    return %c0_i32 : i32
  }
  func.func @transform_2(%arg0: i32) -> i32 {
    %c0_i32 = arith.constant 0 : i32
    %c0_i32_0 = arith.constant 0 : i32
    return %c0_i32 : i32
  }
  func.func @transform_3(%arg0: i32) -> (i32, i32) {
    %c0_i32 = arith.constant 0 : i32
    %c0_i32_0 = arith.constant 0 : i32
    %c0_i32_1 = arith.constant 0 : i32
    return %c0_i32, %c0_i32_0 : i32, i32
  }
  func.func @transform_4(%arg0: i32) -> (i32, i32) {
    %c0_i32 = arith.constant 0 : i32
    %c0_i32_0 = arith.constant 0 : i32
    %c0_i32_1 = arith.constant 0 : i32
    return %c0_i32, %c0_i32_0 : i32, i32
  }
  func.func @transform_5(%arg0: i32) -> (i32, i32) {
    %c0_i32 = arith.constant 0 : i32
    %c0_i32_0 = arith.constant 0 : i32
    return %arg0, %c0_i32 : i32, i32
  }
}

</mosaic_0001>

<bundles_post_ra>
// kernel: tpu_custom_call.1
= control target key start
LH: loop header
LB: loop body
LE: loop exit
PB: predicated region body
PF: predicated region fallthrough
CT: control target
= control target key end

     0   :  { %s1054_s0 = inlined_call_operand.hbm [shape: f32[32,128], index: 0, kind: input, shape index: {}]   ;;  %s1055_s1 = inlined_call_operand.<no memory space> [shape: f32[1], index: 1, kind: input, shape index: {}]   ;;  %s1056_s2 = inlined_call_operand.<no memory space> [shape: f32[1], index: 2, kind: input, shape index: {}]   ;;  %s1057_s3 = inlined_call_operand.hbm [shape: f32[128,384], index: 3, kind: input, shape index: {}]   ;;  %s1058_s4 = inlined_call_operand.vmem [shape: f32[1,384], index: 4, kind: input, shape index: {}]   ;;  %s1059_s5 = inlined_call_operand.hbm [shape: f32[32,384], index: 5, kind: output, shape index: {}]  }
   0x1   :  { %10 = sst [smem:[#allocation2]] %s1055_s1 }
   0x2   :  { %11 = sst [smem:[#allocation3]] %s1056_s2 }
   0x3   :  { %12 = vsyncpa [#allocation5], 0 }
   0x4   :  { %14 = vsyncpa [#allocation5 + $0x1], 0 }
   0x5   :  { %15 = vsyncpa [#allocation8], 0 }
   0x6   :  { %16 = vsyncpa [#allocation6], 0 }
   0x7   :  { %18 = vsyncpa [#allocation6 + $0x1], 0  ;;  %s885_s22 = smov 0   ;;  %s887_s23 = smov 0  }
   0x8   :  { %s889_s24 = smov 0   ;;  %s891_s25 = smov 0  }
   0x9 LB: > { %s906_s1 = sadd.s32 4294967295, %s838_s25   ;;  %s595_s2 = sadd.s32 4294967294, %s838_s25   ;;  %s838_s25 = sphi %s891_s25, %s1069_s25   ;;  %s834_s24 = sphi %s889_s24, %s1068_s24   ;;  %s830_s23 = sphi %s887_s23, %s1067_s23   ;;  %s826_s22 = sphi %s885_s22, %s1066_s22  }
   0xa   : > { %p44_p0 = scmp.ne.s32.totalorder %s830_s23, %s826_s22  ;;  %p45_p1 = scmp.eq.s32.totalorder %s906_s1, 0 }
   0xb   : > { %p152_p2 = scmp.eq.s32.totalorder %s906_s1, 1  ;;  %p158_p3 = scmp.eq.s32.totalorder %s595_s2, 1 }
   0xc   : > { %p915_p4 = por %p45_p1, %p44_p0  ;;  %p596_p5 = scmp.ge.s32.totalorder %s838_s25, 1 }
   0xd   : > { %p920_p6 = por %p158_p3, %p44_p0  ;;  %p165_p7 = scmp.lt.s32.totalorder %s838_s25, 3 }
   0xe   : > { %s182_s30 = sshll.u32 %s1057_s3, 4  ;;  %s840_s7 = smov [#allocation7]   ;;  %s183_s30 = int_to_ptr.hbm [resolvable:$true] %s182_s30 }
   0xf   : > { %p928_p8 = pnand %p596_p5, %p165_p7  ;;  %s184_s8 = sshll.u32 %s840_s7, 4  ;;  %s185_s8 = int_to_ptr.vmem [resolvable:$true] %s184_s8 }
  0x10   : > { %s938_s9 = sadd.s32 1, %s838_s25   ;;  %s841_s10 = smov 384  }
  0x11   : > { %p639_p9 = pneg %p928_p8  ;;  %s842_s11 = smov 24  }
  0x12   : > { %s28_s12 = ssub.s32 %s838_s25, %s938_s9  ;;  %s31_s13 = sadd.s32 1, %s834_s24 }
  0x13   : > { %p640_p10 = pnand %p639_p9, %p45_p1  ;;  %p29_p12 = scmp.eq.s32.totalorder %s28_s12, 0 }
  0x14   : > { %p38_p13 = scmp.ne.s32.totalorder %s834_s24, %s830_s23  ;;  %p39_p0 = scmp.eq.s32.totalorder %s838_s25, 0 }
  0x15   : > { %642 = dma.hbm_to_vmem [thread:$0]  (!%p640_p10), %s183_s30, 6144, %s185_s8, [#allocation8], %s841_s10, %s841_s10, %s842_s11  }
  0x16   : > { %p652_p3 = scmp.lt.s32.totalorder %s838_s25, 2  ;;  %p40_p5 = por %p39_p0, %p38_p13 }
  0x17   : > { %s948_s14 = scalar_select %p29_p12, %s834_s24, %s31_s13  }
  0x18   : > { %p952_p7 = por %p152_p2, %p38_p13  ;;  %s201_s16 = sand.u32 1, %s834_s24  }
  0x19   : > { %s612_s17 = sshll.u32 %s838_s25, 4  ;;  %s599_s18 = sshll.u32 %s201_s16, 4 }
  0x1a   : > { %s210_s21 = scalar_lea.hbm %s1054_s0, %s612_s17  ;;  %s205_s28 = scalar_lea.vmem [#allocation4], %s599_s18 }
  0x1b   : > { %s211_s2 = sshll.u32 %s210_s21, 4  ;;  %s213_s29 = sshll.u32 %s205_s28, 4  ;;  %s212_s2 = int_to_ptr.hbm [resolvable:$true] %s211_s2  ;;  %s214_s29 = int_to_ptr.vmem [resolvable:$true] %s213_s29 }
  0x1c   : > { %p963_p9 = pnand %p652_p3, %p40_p5  ;;  %s202_s7 = scalar_lea.sflag [#allocation5], %s201_s16 }
  0x1d   : > { %s738_s8 = sshra.s32 %s212_s2, 4  ;;  %s745_s13 = scalar_lea.hbm %s1054_s0, 32  ;;  %s739_s8 = int_to_ptr.hbm [resolvable:$true] %s738_s8 }
  0x1e   : > { %s740_s10 = scalar_lea.hbm %s739_s8, 16  ;;  %p742_p10 = pneg %p963_p9 }
  0x1f   : > { %p741_p2 = scmp.ne.s32.totalorder %s739_s8, %s740_s10  ;;  %p746_p0 = scmp.lt.s32.totalorder %s739_s8, %s1054_s0 }
  0x20   : > { %p747_p3 = scmp.lt.s32.totalorder %s745_s13, %s740_s10 }
  0x21   : > { %p743_p12 = pnand %p742_p10, %p741_p2 }
  0x22   : > { %p748_p5 = por %p747_p3, %p746_p0 }
  0x23   : > { %p744_p13 = pneg %p743_p12 }
  0x25   : > { %p749_p11 = pnand %p748_p5, %p744_p13 }
  0x27   : > { %752 = shalt.err (!%p749_p11)
}
  0x28   : > { %s843_s16 = smov 128   ;;  %s844_s19 = smov 8  }
  0x29   : > { %646 = dma.hbm_to_vmem [thread:$0]  (!%p963_p9), %s212_s2, 256, %s214_s29, %s202_s7, %s843_s16, %s843_s16, %s844_s19  }
  0x2a   : > { %225 = sbr.rel (%p928_p8) target bundleno = 482 (0x1e2), region = 40  ;;  %s980_s20 = sand.u32 (!%p928_p8), 1, %s830_s23  }
  0x2b   : > { %s603_s21 = sshll.u32 (!%p928_p8), %s980_s20, 4  ;;  %s228_s28 = scalar_lea.sflag (!%p928_p8), [#allocation5], %s980_s20 }
  0x2c   : > { %s231_s8 = scalar_lea.vmem (!%p928_p8), [#allocation4], %s603_s21 }
  0x2f   : > { %813 = dma.done.wait (%p915_p4), %s228_s28, 256  }
  0x30   : > { %815 = vsyncadd (%p915_p4), %s228_s28, 4294967040 }
  0x31   : > { %817 = dma.done.wait (%p45_p1), [#allocation8], 6144  }
  0x32   : > { %819 = vsyncadd (%p45_p1), [#allocation8], 4294961152  ;;  %v266_v0 = vld [vmem:[%s231_s8] sm:$0xff]  ;;  %v267_v1 = vld [vmem:[%s231_s8 + $0x8] sm:$0xff]  ;;  %v845_v2 = vmov 128.0   ;;  %v846_v17 = vmov 127.0  }
  0x33   : > { %270 = vadd.xlane.f32.xlu0 %v266_v0  ;;  %696 = vrcp.f32 %v845_v2  ;;  %v409_v20 = vld [vmem:[#allocation7 + $0x168] sm:$0xff]  ;;  %v410_v21 = vld [vmem:[#allocation7 + $0x170] sm:$0xff]  ;;  %v411_v22 = vld [vmem:[#allocation7 + $0x178] sm:$0xff]  ;;  %s1009_s26 = sld [smem:[#allocation2]]  ;;  %s629_s30 = smul.u32 48, %s980_s20 }
  0x34   : > { %698 = vrcp.f32 %v846_v17  ;;  %420 = vmatpush.msra.mxu0 %v409_v20  ;;  %443 = vmatpush.msra.mxu1 %v410_v21  ;;  %v406_v23 = vld [vmem:[#allocation7 + $0x150] sm:$0xff]  ;;  %v407_v24 = vld [vmem:[#allocation7 + $0x158] sm:$0xff]  ;;  %v408_v25 = vld [vmem:[#allocation7 + $0x160] sm:$0xff]  ;;  %s1011_s6 = sld [smem:[#allocation3]]  ;;  %s630_s10 = smul.u32 48, %s906_s1 }
  0x35   : > { %466 = vmatpush.msra.mxu2 %v411_v22  ;;  %613 = vmatpush.msra.mxu3 %v409_v20  ;;  %v403_v27 = vld [vmem:[#allocation7 + $0x138] sm:$0xff]  ;;  %v404_v28 = vld [vmem:[#allocation7 + $0x140] sm:$0xff]  ;;  %v405_v29 = vld [vmem:[#allocation7 + $0x148] sm:$0xff]  ;;  %s263_s7 = scalar_lea.vmem [#allocation9], %s629_s30  ;;  %s496_s1 = scalar_lea.sflag [#allocation6], %s980_s20 }
  0x36   : > { %421 = vmatpush.msra.mxu0 %v406_v23  ;;  %444 = vmatpush.msra.mxu1 %v407_v24  ;;  %v400_v30 = vld [vmem:[#allocation7 + $0x120] sm:$0xff]  ;;  %v401_v31 = vld [vmem:[#allocation7 + $0x128] sm:$0xff]  ;;  %v402_v32 = vld [vmem:[#allocation7 + $0x130] sm:$0xff]  ;;  %s508_s13 = scalar_lea.hbm %s1059_s5, %s630_s10  ;;  %s509_s17 = sshll.u32 %s263_s7, 4  ;;  %s510_s17 = int_to_ptr.vmem [resolvable:$true] %s509_s17 }
  0x37   : > { %467 = vmatpush.msra.mxu2 %v408_v25  ;;  %614 = vmatpush.msra.mxu3 %v406_v23  ;;  %v397_v34 = vld [vmem:[#allocation7 + $0x108] sm:$0xff]  ;;  %v398_v35 = vld [vmem:[#allocation7 + $0x110] sm:$0xff]  ;;  %v399_v36 = vld [vmem:[#allocation7 + $0x118] sm:$0xff]  ;;  %s511_s18 = sshll.u32 %s508_s13, 4  ;;  %s788_s8 = scalar_lea.hbm %s1059_s5, 96  ;;  %s512_s18 = int_to_ptr.hbm [resolvable:$true] %s511_s18 }
  0x38   : > { %422 = vmatpush.msra.mxu0 %v403_v27  ;;  %445 = vmatpush.msra.mxu1 %v404_v28  ;;  %v394_v37 = vld [vmem:[#allocation7 + $0xf0] sm:$0xff]  ;;  %v395_v38 = vld [vmem:[#allocation7 + $0xf8] sm:$0xff]  ;;  %v396_v39 = vld [vmem:[#allocation7 + $0x100] sm:$0xff]  ;;  %s782_s16 = sshra.s32 %s512_s18, 4  ;;  %s783_s16 = int_to_ptr.hbm [resolvable:$true] %s782_s16 }
  0x39   : > { %v697_v3 = vpop.eup %696  ;;  %468 = vmatpush.msra.mxu2 %v405_v29  ;;  %615 = vmatpush.msra.mxu3 %v403_v27  ;;  %v391_v41 = vld [vmem:[#allocation7 + $0xd8] sm:$0xff]  ;;  %v392_v42 = vld [vmem:[#allocation7 + $0xe0] sm:$0xff]  ;;  %v393_v43 = vld [vmem:[#allocation7 + $0xe8] sm:$0xff]  ;;  %s784_s19 = scalar_lea.hbm %s783_s16, 48  ;;  %p789_p11 = scmp.lt.s32.totalorder %s783_s16, %s1059_s5 }
  0x3a   : > { %v275_v4 = vmul.f32 128.0, %v697_v3  ;;  %vm279_vm0 = vweird.f32 %v697_v3  ;;  %v699_v18 = vpop.eup %698  ;;  %423 = vmatpush.msra.mxu0 %v400_v30  ;;  %446 = vmatpush.msra.mxu1 %v401_v31  ;;  %v388_v44 = vld [vmem:[#allocation7 + $0xc0] sm:$0xff]  ;;  %v389_v45 = vld [vmem:[#allocation7 + $0xc8] sm:$0xff]  ;;  %v390_v46 = vld [vmem:[#allocation7 + $0xd0] sm:$0xff]  ;;  %p785_p1 = scmp.ne.s32.totalorder %s783_s16, %s784_s19  ;;  %p790_p9 = scmp.lt.s32.totalorder %s788_s8, %s784_s19 }
  0x3b   : > { %272 = vadd.xlane.f32.xlu0 %v267_v1  ;;  %v292_v19 = vmul.f32 127.0, %v699_v18  ;;  %469 = vmatpush.msra.mxu2 %v402_v32  ;;  %vm296_vm1 = vweird.f32 %v699_v18  ;;  %v385_v47 = vld [vmem:[#allocation7 + $0xa8] sm:$0xff]  ;;  %v386_v48 = vld [vmem:[#allocation7 + $0xb0] sm:$0xff]  ;;  %v387_v50 = vld [vmem:[#allocation7 + $0xb8] sm:$0xff] }
  0x3c   : > { %v276_v5 = vsub.f32 1.0, %v275_v4  ;;  %616 = vmatpush.msra.mxu3 %v400_v30  ;;  %424 = vmatpush.msra.mxu0 %v397_v34  ;;  %v382_v51 = vld [vmem:[#allocation7 + $0x90] sm:$0xff]  ;;  %v383_v52 = vld [vmem:[#allocation7 + $0x98] sm:$0xff]  ;;  %v384_v54 = vld [vmem:[#allocation7 + $0xa0] sm:$0xff]  ;;  %p786_p4 = pnand %p785_p1, %p952_p7  ;;  %p791_p2 = por %p790_p9, %p789_p11 }
  0x3d   : > { %v293_v26 = vsub.f32 1.0, %v292_v19  ;;  %447 = vmatpush.msra.mxu1 %v398_v35  ;;  %470 = vmatpush.msra.mxu2 %v399_v36  ;;  %v379_v56 = vld [vmem:[#allocation7 + $0x78] sm:$0xff]  ;;  %v380_v57 = vld [vmem:[#allocation7 + $0x80] sm:$0xff]  ;;  %v381_v58 = vld [vmem:[#allocation7 + $0x88] sm:$0xff] }
  0x3e   : > { %v277_v6 = vmul.f32 %v697_v3, %v276_v5  ;;  %617 = vmatpush.msra.mxu3 %v397_v34  ;;  %425 = vmatpush.msra.mxu0 %v394_v37  ;;  %v376_v59 = vld [vmem:[#allocation7 + $0x60] sm:$0xff]  ;;  %v377_v60 = vld [vmem:[#allocation7 + $0x68] sm:$0xff]  ;;  %v378_v61 = vld [vmem:[#allocation7 + $0x70] sm:$0xff]  ;;  %p787_p8 = pneg %p786_p4 }
  0x3f   : > { %v294_v33 = vmul.f32 %v699_v18, %v293_v26  ;;  %448 = vmatpush.msra.mxu1 %v395_v38  ;;  %471 = vmatpush.msra.mxu2 %v396_v39  ;;  %v373_v62 = vld [vmem:[#allocation7 + $0x48] sm:$0xff]  ;;  %v374_v63 = vld [vmem:[#allocation7 + $0x50] sm:$0xff]  ;;  %v371_v2 = vld [vmem:[#allocation7 + $0x38] sm:$0xff] }
  0x40   : > { %v278_v7 = vadd.f32 %v697_v3, %v277_v6  ;;  %618 = vmatpush.msra.mxu3 %v394_v37  ;;  %426 = vmatpush.msra.mxu0 %v391_v41  ;;  %v372_v4 = vld [vmem:[#allocation7 + $0x40] sm:$0xff]  ;;  %p792_p10 = pnand %p791_p2, %p787_p8 }
  0x41   : > { %v295_v40 = vadd.f32 %v699_v18, %v294_v33  ;;  %449 = vmatpush.msra.mxu1 %v392_v42  ;;  %472 = vmatpush.msra.mxu2 %v393_v43  ;;  %v356_v42 = vstv %s1009_s26 }
  0x42   : > { %v280_v8 = vsel %vm279_vm0, %v697_v3, %v278_v7  ;;  %619 = vmatpush.msra.mxu3 %v391_v41  ;;  %427 = vmatpush.msra.mxu0 %v388_v44  ;;  %v367_v7 = vld [vmem:[#allocation7 + $0x18] sm:$0xff] }
  0x43   : > { %v297_v49 = vsel %vm296_vm1, %v699_v18, %v295_v40  ;;  %450 = vmatpush.msra.mxu1 %v389_v45  ;;  %473 = vmatpush.msra.mxu2 %v390_v46 }
  0x44   : > { %620 = vmatpush.msra.mxu3 %v388_v44  ;;  %428 = vmatpush.msra.mxu0 %v385_v47 }
  0x45   : > { %451 = vmatpush.msra.mxu1 %v386_v48  ;;  %474 = vmatpush.msra.mxu2 %v387_v50  ;;  %v361_v50 = vstv %s1011_s6 }
  0x46   : > { %621 = vmatpush.msra.mxu3 %v385_v47  ;;  %429 = vmatpush.msra.mxu0 %v382_v51 }
  0x47   : > { %452 = vmatpush.msra.mxu1 %v383_v52  ;;  %475 = vmatpush.msra.mxu2 %v384_v54 }
  0x48   : > { %622 = vmatpush.msra.mxu3 %v382_v51  ;;  %430 = vmatpush.msra.mxu0 %v379_v56 }
  0x49   : > { %453 = vmatpush.msra.mxu1 %v380_v57  ;;  %476 = vmatpush.msra.mxu2 %v381_v58 }
  0x4a   : > { %623 = vmatpush.msra.mxu3 %v379_v56  ;;  %431 = vmatpush.msra.mxu0 %v376_v59 }
  0x4b   : > { %454 = vmatpush.msra.mxu1 %v377_v60  ;;  %477 = vmatpush.msra.mxu2 %v378_v61 }
  0x4c   : > { %624 = vmatpush.msra.mxu3 %v376_v59  ;;  %432 = vmatpush.msra.mxu0 %v373_v62 }
  0x4d   : > { %455 = vmatpush.msra.mxu1 %v374_v63  ;;  %v412_v63 = vld [vmem:[%s1058_s4] sm:$0x7] }
  0x4e   : > { %625 = vmatpush.msra.mxu3 %v373_v62 }
  0x4f   : > { %456 = vmatpush.msra.mxu1 %v371_v2 }
  0xa6   : > { %v271_v9 = vpop.xlane.xlu0 %270 }
  0xa7   : > { %v281_v10 = vmul.f32 %v280_v8, %v271_v9 }
  0xa9   : > { %v992_v11 = vsub.f32 %v266_v0, %v281_v10  ;;  %v375_v0 = vld [vmem:[#allocation7 + $0x58] sm:$0xff]  ;;  %v369_v10 = vld [vmem:[#allocation7 + $0x28] sm:$0xff] }
  0xaa   : > { %478 = vmatpush.msra.mxu2 %v375_v0  ;;  %v414_v0 = vperm.slane %v412_v63, 0 }
  0xab   : > { %v285_v12 = vmul.f32 %v992_v11, %v992_v11  ;;  %v357_v46 = vmul.f32 %v356_v42, %v992_v11 }
  0xac   : > { %479 = vmatpush.msra.mxu2 %v372_v4 }
  0xad   : > { %287 = vadd.xlane.f32.xlu1 %v285_v12  ;;  %v364_v12 = vld [vmem:[#allocation7] sm:$0xff] }
  0xae   : > { %v273_v13 = vpop.xlane.xlu0 %272  ;;  %480 = vmatpush.msra.mxu2 %v369_v10 }
  0xaf   : > { %v282_v14 = vmul.f32 %v280_v8, %v273_v13  ;;  %v368_v8 = vld [vmem:[#allocation7 + $0x20] sm:$0xff]  ;;  %v365_v13 = vld [vmem:[#allocation7 + $0x8] sm:$0xff] }
  0xb0   : > { %457 = vmatpush.msra.mxu1 %v368_v8 }
  0xb1   : > { %v996_v15 = vsub.f32 %v267_v1, %v282_v14  ;;  %v370_v1 = vld [vmem:[#allocation7 + $0x30] sm:$0xff] }
  0xb2   : > { %433 = vmatpush.msra.mxu0 %v370_v1  ;;  %626 = vmatpush.msra.mxu3 %v370_v1  ;;  %v415_v1 = vperm.slane %v412_v63, 1 }
  0xb3   : > { %v286_v16 = vmul.f32 %v996_v15, %v996_v15  ;;  %458 = vmatpush.msra.mxu1 %v365_v13  ;;  %v358_v58 = vmul.f32 %v356_v42, %v996_v15 }
  0xb4   : > { %434 = vmatpush.msra.mxu0 %v367_v7  ;;  %627 = vmatpush.msra.mxu3 %v367_v7 }
  0xb5   : > { %289 = vadd.xlane.f32.xlu1 %v286_v16  ;;  %v366_v16 = vld [vmem:[#allocation7 + $0x10] sm:$0xff] }
  0xb6   : > { %435 = vmatpush.msra.mxu0 %v364_v12  ;;  %481 = vmatpush.msra.mxu2 %v366_v16 }
  0xb7   : > { %628 = vmatpush.msra.mxu3 %v364_v12 }
 0x120   : > { %v288_v53 = vpop.xlane.xlu1 %287 }
 0x121   : > { %v1000_v55 = vmul.f32 %v297_v49, %v288_v53 }
 0x123   : > { %700 = vrsqrt.f32 %v1000_v55  ;;  %vm307_vm2 = vcmp.eq.f32.partialorder %v1000_v55, inf  ;;  %v310_v24 = vand.u32 2147483648, %v1000_v55  ;;  %vm309_vm3 = vcmp.eq.f32.partialorder %v1000_v55, 0.0 }
 0x128   : > { %v290_v3 = vpop.xlane.xlu1 %289 }
 0x129   : > { %v701_v5 = vpop.eup %700  ;;  %v299_v6 = vmul.f32 %v297_v49, %v290_v3 }
 0x12a   : > { %v301_v9 = vmul.f32 %v701_v5, %v1000_v55 }
 0x12b   : > { %702 = vrsqrt.f32 %v299_v6  ;;  %vm319_vm4 = vcmp.eq.f32.partialorder %v299_v6, inf  ;;  %v322_v32 = vand.u32 2147483648, %v299_v6  ;;  %vm321_vm5 = vcmp.eq.f32.partialorder %v299_v6, 0.0 }
 0x12c   : > { %v302_v14 = vmul.f32 %v701_v5, %v301_v9 }
 0x12e   : > { %v303_v17 = vmul.f32 0.5, %v302_v14 }
 0x130   : > { %v304_v18 = vsub.f32 1.5, %v303_v17 }
 0x131   : > { %v703_v19 = vpop.eup %702 }
 0x132   : > { %v305_v20 = vmul.f32 %v701_v5, %v304_v18  ;;  %v313_v21 = vmul.f32 %v703_v19, %v299_v6  ;;  %v416_v5 = vperm.slane %v412_v63, 2 }
 0x134   : > { %v306_v22 = vmul.f32 %v305_v20, %v1000_v55  ;;  %v314_v23 = vmul.f32 %v703_v19, %v313_v21 }
 0x136   : > { %v315_v25 = vmul.f32 0.5, %v314_v23  ;;  %v308_v26 = vsel %vm307_vm2, %v1000_v55, %v306_v22 }
 0x137   : > { %v311_v27 = vsel %vm309_vm3, %v310_v24, %v308_v26 }
 0x138   : > { %v316_v28 = vsub.f32 1.5, %v315_v25  ;;  %v605_v29 = vadd.f32 -1e-06, %v311_v27 }
 0x13a   : > { %v317_v30 = vmul.f32 %v703_v19, %v316_v28  ;;  %704 = vrcp.f32 %v605_v29  ;;  %v337_v39 = vand.u32 2147483648, %v605_v29  ;;  %v335_v41 = vand.u32 2147483647, %v605_v29 }
 0x13b   : > { %vm331_vm7 = vweird.f32 %v605_v29 }
 0x13c   : > { %v318_v31 = vmul.f32 %v317_v30, %v299_v6  ;;  %v338_v45 = vor.u32 1.1754944e-38, %v337_v39  ;;  %vm336_vm9 = vcmp.eq.f32.partialorder %v335_v41, 8.507059e+37 }
 0x13e   : > { %v320_v33 = vsel %vm319_vm4, %v299_v6, %v318_v31 }
 0x13f   : > { %v323_v34 = vsel %vm321_vm5, %v322_v32, %v320_v33 }
 0x140   : > { %v705_v35 = vpop.eup %704  ;;  %v606_v36 = vadd.f32 -1e-06, %v323_v34 }
 0x141   : > { %v327_v37 = vmul.f32 %v705_v35, %v605_v29  ;;  %vm332_vm6 = vweird.f32 %v705_v35 }
 0x142   : > { %706 = vrcp.f32 %v606_v36  ;;  %vm333_vm8 = vmor %vm331_vm7, %vm332_vm6  ;;  %v352_v53 = vand.u32 2147483648, %v606_v36  ;;  %v350_v56 = vand.u32 2147483647, %v606_v36  ;;  %vm346_vm11 = vweird.f32 %v606_v36 }
 0x143   : > { %v328_v38 = vsub.f32 1.0, %v327_v37 }
 0x144   : > { %v353_v11 = vor.u32 1.1754944e-38, %v352_v53  ;;  %vm351_vm13 = vcmp.eq.f32.partialorder %v350_v56, 8.507059e+37 }
 0x145   : > { %v329_v40 = vmul.f32 %v705_v35, %v328_v38 }
 0x147   : > { %v330_v43 = vadd.f32 %v705_v35, %v329_v40 }
 0x148   : > { %v707_v44 = vpop.eup %706 }
 0x149   : > { %v334_v47 = vsel %vm333_vm8, %v705_v35, %v330_v43  ;;  %v342_v48 = vmul.f32 %v707_v44, %v606_v36  ;;  %vm347_vm10 = vweird.f32 %v707_v44 }
 0x14a   : > { %v339_v49 = vsel %vm336_vm9, %v338_v45, %v334_v47  ;;  %vm348_vm12 = vmor %vm346_vm11, %vm347_vm10 }
 0x14b   : > { %v359_v51 = vmul.f32 %v357_v46, %v339_v49  ;;  %v343_v52 = vsub.f32 1.0, %v342_v48 }
 0x14d   : > { %v362_v54 = vadd.f32 %v361_v50, %v359_v51  ;;  %v344_v55 = vmul.f32 %v707_v44, %v343_v52 }
 0x14f   : > { %436 = vmatmul.f32.vlgmr.msra.gmra.mxu0 %v362_v54  ;;  %459 = vmatmul.f32.vlgmr.msra.gmra.mxu1 %v362_v54  ;;  %v345_v57 = vadd.f32 %v707_v44, %v344_v55 }
 0x150   : > { %482 = vmatmul.f32.vlgmr.msra.gmra.mxu2 %v362_v54 }
 0x151   : > { %v349_v59 = vsel %vm348_vm12, %v707_v44, %v345_v57 }
 0x152   : > { %v354_v60 = vsel %vm351_vm13, %v353_v11, %v349_v59 }
 0x153   : > { %v360_v61 = vmul.f32 %v358_v58, %v354_v60 }
 0x155   : > { %v363_v62 = vadd.f32 %v361_v50, %v360_v61 }
 0x157   : > { %439 = vmatmul.f32.vlgmr.msra.gmra.mxu3 %v363_v62  ;;  %462 = vmatmul.f32.gmra.mxu1 %v363_v62 }
 0x158   : > { %485 = vmatmul.f32.gmra.mxu2 %v363_v62 }
 0x1cc   : > { %v437_v2 = vpop.f32.mrf.mxu0  ;;  %v460_v3 = vpop.f32.mrf.mxu1 }
 0x1cd   : > { %v438_v4 = vadd.f32 %v437_v2, %v414_v0  ;;  %v461_v15 = vadd.f32 %v460_v3, %v415_v1 }
 0x1cf   : > { %489 = vst [vmem:[%s263_s7] sm:$0xff] %v438_v4 }
 0x1d0   : > { %490 = vst [vmem:[%s263_s7 + $0x8] sm:$0xff] %v461_v15 }
 0x1d3   : > { %v483_v6 = vpop.f32.mrf.mxu2 }
 0x1d4   : > { %v484_v7 = vadd.f32 %v483_v6, %v416_v5  ;;  %v463_v8 = vpop.f32.mrf.mxu1 }
 0x1d5   : > { %v464_v9 = vadd.f32 %v463_v8, %v415_v1 }
 0x1d6   : > { %491 = vst [vmem:[%s263_s7 + $0x10] sm:$0xff] %v484_v7 }
 0x1d7   : > { %493 = vst [vmem:[%s263_s7 + $0x20] sm:$0xff] %v464_v9 }
 0x1da   : > { %v440_v10 = vpop.f32.mrf.mxu3 }
 0x1db   : > { %v441_v12 = vadd.f32 %v440_v10, %v414_v0  ;;  %v486_v13 = vpop.f32.mrf.mxu2 }
 0x1dc   : > { %v487_v14 = vadd.f32 %v486_v13, %v416_v5 }
 0x1dd   : > { %492 = vst [vmem:[%s263_s7 + $0x18] sm:$0xff] %v441_v12 }
 0x1de   : > { %494 = vst [vmem:[%s263_s7 + $0x28] sm:$0xff] %v487_v14 }
 0x1df   : > { %795 = shalt.err (!%p792_p10)
}
 0x1e0   : > { %s847_s20 = smov 384   ;;  %s848_s2 = smov 24  }
 0x1e1   : > { %637 = dma.vmem_to_hbm [thread:$0]  (%p952_p7), %s510_s17, 768, %s512_s18, %s496_s1, %s847_s20, %s847_s20, %s848_s2  }
 0x1e2 PF: > { %s526_s29 = sand.u32 1, %s826_s22   ;;  %p1065_p12 = scmp.ge.s32.totalorder %s838_s25, 2 }
 0x1e3   : > { %s527_s30 = scalar_lea.sflag [#allocation6], %s526_s29 }
 0x1e4   : > { %p648_p13 = pnand %p1065_p12, %p920_p6 }
 0x1e6   : > { %p649_p0 = pneg %p648_p13 }
 0x1e8   : > { %821 = dma.done.wait (%p649_p0), %s527_s30, 768  }
 0x1e9   : > { %823 = vsyncadd (%p649_p0), %s527_s30, 4294966528  ;;  %p21_p3 = scmp.ge.s32.totalorder %s938_s9, 4   ;;  %s1066_s22 = smov %s830_s23 }
 0x1ea   : > { %s1067_s23 = smov %s834_s24  ;;  %s1068_s24 = smov %s948_s14 }
 0x1eb   : > { %s1069_s25 = smov %s938_s9  ;;  %23 = sbr.rel (!%p21_p3) target bundleno = 9 (0x9), region = 89 }
 0x1f0   :  { %533 = vsyncpa [#allocation5], 1 }
 0x1f1   :  { %535 = vsyncpa [#allocation5 + $0x1], 1 }
 0x1f2   :  { %536 = vsyncpa [#allocation8], 1 }
 0x1f3   :  { %537 = vsyncpa [#allocation6], 1 }
 0x1f4   :  { %539 = vsyncpa [#allocation6 + $0x1], 1 }

</bundles_post_ra>
